<compile_context>
chip_gen: v7x
topology: tpu7x:2x2x1
jax: 0.10.0
libtpu: 0.0.40
codegen_flags: <defaults>
</compile_context>

<pallas_src>
import functools

import jax
import jax.numpy as jnp
from jax.experimental import pallas as pl
from jax.experimental.pallas import tpu as pltpu

_BN_EPS = 1e-5
_PALLAS_MIN_M = 256                      # below this, launch/pad overhead > work
_VMEM_LIMIT = 32 * 1024 * 1024           # scoped limit: safe on v5e/v6e/v7x
_VMEM_BUDGET = 20 * 1024 * 1024          # budget for double-buffered blocks

# ConvTranspose2d(k=4, s=2, p=1) parity decomposition: output row 2a + r pulls
# (zero-padded) input rows {a-1+r, a+r} through kernel taps
# _TAPS[r] = (kh for dh=0, kh for dh=1); identically for columns.
_TAPS = ((3, 1), (2, 0))


def _apply_act(y, act):
    if act == "lrelu":
        return jnp.where(y > 0, y, 0.2 * y)
    if act == "relu":
        return jnp.maximum(y, 0.0)
    if act == "tanh":
        return jnp.tanh(y)
    return y


# ------------------------------ Pallas kernel ------------------------------ #
def _fused_matmul_kernel(w_ref, a_ref, b_ref, o_ref, *, act):
    # w: (cout, K) bf16, a: (K, TM) bf16, b: (cout, 1) f32 -> out (cout, TM)
    acc = jnp.dot(w_ref[...], a_ref[...], preferred_element_type=jnp.float32)
    o_ref[...] = _apply_act(acc + b_ref[...], act).astype(o_ref.dtype)


def _round_up(x, m):
    return (x + m - 1) // m * m


def _pick_tm(m, bsz, k, nout):
    """Largest lane tile that fits the VMEM budget; keep >=2 total parallel
    grid steps (feeds both v7x TensorCores) only while the tile stays >=1024
    rows, since per-step overhead is negligible at that size.  On 1-TC
    v5e/v6e the extra step costs ~0.35us and the tiles stay large."""
    best = None
    for tm in (16384, 8192, 4096, 2048, 1024, 512, 256, 128):
        if m % tm:
            continue
        # double-buffered A + out + W blocks (bf16) plus the f32 accumulator
        vmem = 2 * tm * (k + nout) * 2 + 2 * nout * k * 2 + nout * tm * 4
        if vmem > _VMEM_BUDGET:
            continue
        if best is None:
            best = tm
        if bsz * (m // tm) >= 2 and tm >= 1024:
            return tm
    return best if best is not None else 128


def fused_matmul_t(w, a, bias, act):
    """act(w @ a + bias[:,None]) per batch, lane-dense in M.
       w: (B, nout, K) bf16, a: (B, K, M) bf16, bias: (nout,) f32
       -> (B, nout, M) bf16."""
    bsz, nout, k = w.shape
    m = a.shape[-1]
    bias2 = bias.reshape(nout, 1).astype(jnp.float32)

    if m < _PALLAS_MIN_M:
        # Tiny inner U-Net stages (8x8 .. 1x1): plain XLA matmul inside the
        # same jit region; Pallas launch + lane padding would dwarf the work.
        acc = jnp.einsum("bnk,bkm->bnm", w, a,
                         preferred_element_type=jnp.float32)
        return _apply_act(acc + bias2[None], act).astype(jnp.bfloat16)

    tm = _pick_tm(m, bsz, k, nout)
    mp = _round_up(m, tm)
    if mp != m:
        a = jnp.pad(a, ((0, 0), (0, 0), (0, mp - m)))

    out = pl.pallas_call(
        functools.partial(_fused_matmul_kernel, act=act),
        out_shape=jax.ShapeDtypeStruct((bsz, nout, mp), jnp.bfloat16),
        grid_spec=pltpu.PrefetchScalarGridSpec(
            num_scalar_prefetch=0,
            grid=(bsz, mp // tm),
            in_specs=[
                pl.BlockSpec((None, nout, k), lambda p, i: (p, 0, 0)),
                pl.BlockSpec((None, k, tm), lambda p, i: (p, 0, i)),
                pl.BlockSpec((nout, 1), lambda p, i: (0, 0)),
            ],
            out_specs=pl.BlockSpec((None, nout, tm), lambda p, i: (p, 0, i)),
        ),
        compiler_params=pltpu.CompilerParams(
            dimension_semantics=("parallel", "parallel"),
            vmem_limit_bytes=_VMEM_LIMIT),
    )(w, a, bias2)
    return out if mp == m else out[..., :m]


# ------------------------------ conv wrappers ------------------------------ #
def conv_down(x, w_mat, bias, act):
    """Conv2d(k=4, s=2, p=1, reflect) + folded BN + activation.
       x: (C, N, H, W) bf16; w_mat: (cout, C*16) bf16 -> (cout, N, H/2, W/2)."""
    c, n, h, w = x.shape
    cout = w_mat.shape[0]
    ho, wo = h // 2, w // 2
    xp = jnp.pad(x, ((0, 0), (0, 0), (1, 1), (1, 1)), mode="reflect")
    slabs = []
    for kh in range(4):
        for kw in range(4):
            slabs.append(xp[:, :, kh:kh + 2 * ho - 1:2, kw:kw + 2 * wo - 1:2])
    a = jnp.stack(slabs, axis=1)                     # (C, 16, N, ho, wo)
    a = a.reshape(c * 16, n * ho * wo)[None]         # (1, K, M)  K = c*16+kh*4+kw
    out = fused_matmul_t(w_mat[None], a, bias, act)  # (1, cout, M)
    return out[0].reshape(cout, n, ho, wo)


def conv_up(x, w_mats, bias, act):
    """ConvTranspose2d(k=4, s=2, p=1) + folded BN + activation, lowered as 4
    parity sub-convolutions (2x2 effective taps) in ONE batched pallas_call.
       x: (Cin, N, H, W) bf16; w_mats: (4, cout, Cin*4) -> (cout, N, 2H, 2W)."""
    cin, n, h, w = x.shape
    cout = w_mats.shape[1]
    xp = jnp.pad(x, ((0, 0), (0, 0), (1, 1), (1, 1)))  # zero pad by 1
    pats = []
    for r in range(2):
        for c in range(2):
            taps = [xp[:, :, r + dh:r + dh + h, c + dw:c + dw + w]
                    for dh in range(2) for dw in range(2)]
            t = jnp.stack(taps, axis=1)              # (Cin, 4, N, H, W)
            pats.append(t.reshape(cin * 4, n * h * w))
    a = jnp.stack(pats, axis=0)                      # (4, Cin*4, M)
    out = fused_matmul_t(w_mats, a, bias, act)       # (4, cout, M)
    out = out.reshape(2, 2, cout, n, h, w)           # (r, c, co, n, i, j)
    y = jnp.transpose(out, (2, 3, 4, 0, 5, 1))       # (co, n, i, r, j, c)
    return y.reshape(cout, n, 2 * h, 2 * w)


# ------------------------- weight folding / params -------------------------- #
def _fold_down_weight(w, b, scale):
    """w:(cout,cin,4,4), b:(cout,), scale:(cout,) -> ((cout,cin*16) bf16, f32)."""
    cout = w.shape[0]
    w_mat = w.reshape(cout, -1) * scale[:, None]
    return w_mat.astype(jnp.bfloat16), (b * scale).astype(jnp.float32)


def _fold_up_weight(w, b, scale):
    """w:(cin,cout,4,4) ConvTranspose weight -> ((4,cout,cin*4) bf16, f32)."""
    cin, cout = w.shape[0], w.shape[1]
    mats = []
    for r in range(2):
        for c in range(2):
            sub = jnp.take(w, jnp.array(_TAPS[r]), axis=2)
            sub = jnp.take(sub, jnp.array(_TAPS[c]), axis=3)   # (cin,cout,2,2)
            m = jnp.transpose(sub, (1, 0, 2, 3)).reshape(cout, cin * 4)
            mats.append(m * scale[:, None])
    w_mats = jnp.stack(mats, axis=0)                 # (4, cout, cin*4)
    return w_mats.astype(jnp.bfloat16), (b * scale).astype(jnp.float32)


def make_params(key, in_channels=3, features=8):
    f = features
    keys = iter(jax.random.split(key, 64))

    def bn_scale(cout):
        # eval-mode BatchNorm, default init: gamma=1, beta=0, mean=0, var=1
        return jnp.full((cout,), 1.0 / jnp.sqrt(1.0 + _BN_EPS), jnp.float32)

    def down(cin, cout, with_bn):
        w = 0.05 * jax.random.normal(next(keys), (cout, cin, 4, 4), jnp.float32)
        b = 0.05 * jax.random.normal(next(keys), (cout,), jnp.float32)
        s = bn_scale(cout) if with_bn else jnp.ones((cout,), jnp.float32)
        return _fold_down_weight(w, b, s)

    def up(cin, cout, with_bn, bias):
        w = 0.05 * jax.random.normal(next(keys), (cin, cout, 4, 4), jnp.float32)
        b = (0.05 * jax.random.normal(next(keys), (cout,), jnp.float32)
             if bias else jnp.zeros((cout,), jnp.float32))
        s = bn_scale(cout) if with_bn else jnp.ones((cout,), jnp.float32)
        return _fold_up_weight(w, b, s)

    return {
        "d1": down(in_channels, f, with_bn=False),
        "d2": down(f, 2 * f, True),
        "d3": down(2 * f, 4 * f, True),
        "d4": down(4 * f, 8 * f, True),
        "d5": down(8 * f, 8 * f, True),
        "d6": down(8 * f, 8 * f, True),
        "d7": down(8 * f, 8 * f, True),
        "bottleneck": down(8 * f, 8 * f, with_bn=False),
        "u1": up(8 * f, 8 * f, True, bias=False),
        "u2": up(16 * f, 8 * f, True, bias=False),
        "u3": up(16 * f, 8 * f, True, bias=False),
        "u4": up(16 * f, 8 * f, True, bias=False),
        "u5": up(16 * f, 4 * f, True, bias=False),
        "u6": up(8 * f, 2 * f, True, bias=False),
        "u7": up(4 * f, f, True, bias=False),
        "ufinal": up(2 * f, in_channels, False, bias=True),
    }


# ------------------------------ forward pass -------------------------------- #
def generator_forward(x_nchw, p):
    # NCHW -> channel-major (C, N, H, W) bf16 used throughout the network
    x = jnp.transpose(x_nchw, (1, 0, 2, 3)).astype(jnp.bfloat16)
    x1 = conv_down(x,  *p["d1"], act="lrelu")
    x2 = conv_down(x1, *p["d2"], act="lrelu")
    x3 = conv_down(x2, *p["d3"], act="lrelu")
    x4 = conv_down(x3, *p["d4"], act="lrelu")
    x5 = conv_down(x4, *p["d5"], act="lrelu")
    x6 = conv_down(x5, *p["d6"], act="lrelu")
    x7 = conv_down(x6, *p["d7"], act="lrelu")
    x8 = conv_down(x7, *p["bottleneck"], act="relu")

    y1 = conv_up(x8, *p["u1"], act="relu")
    y2 = conv_up(jnp.concatenate([y1, x7], axis=0), *p["u2"], act="relu")
    y3 = conv_up(jnp.concatenate([y2, x6], axis=0), *p["u3"], act="relu")
    y4 = conv_up(jnp.concatenate([y3, x5], axis=0), *p["u4"], act="relu")
    y5 = conv_up(jnp.concatenate([y4, x4], axis=0), *p["u5"], act="relu")
    y6 = conv_up(jnp.concatenate([y5, x3], axis=0), *p["u6"], act="relu")
    y7 = conv_up(jnp.concatenate([y6, x2], axis=0), *p["u7"], act="relu")
    y8 = conv_up(jnp.concatenate([y7, x1], axis=0), *p["ufinal"], act="tanh")
    return jnp.transpose(y8, (1, 0, 2, 3)).astype(jnp.float32)   # -> NCHW


# --------------------------------- checks ----------------------------------- #
def _check_fused_matmul(key):
    kw, ka = jax.random.split(key)
    w = jax.random.normal(kw, (2, 24, 96), jnp.float32).astype(jnp.bfloat16)
    a = jax.random.normal(ka, (2, 96, 512), jnp.float32).astype(jnp.bfloat16)
    bias = jnp.linspace(-0.5, 0.5, 24, dtype=jnp.float32)
    got = jax.block_until_ready(fused_matmul_t(w, a, bias, "lrelu"))
    ref = _apply_act(
        jnp.einsum("bnk,bkm->bnm", w, a, preferred_element_type=jnp.float32)
        + bias[None, :, None], "lrelu").astype(jnp.bfloat16)
    assert bool(jnp.allclose(got.astype(jnp.float32), ref.astype(jnp.float32),
                             atol=5e-2, rtol=5e-2)), "fused_matmul_t mismatch"


def _check_conv_down(key):
    cin, cout, hh = 8, 16, 64
    kx, kw, kb = jax.random.split(key, 3)
    x_bf = jax.random.normal(kx, (1, cin, hh, hh), jnp.float32).astype(jnp.bfloat16)
    x_q = x_bf.astype(jnp.float32)
    w_q = (0.05 * jax.random.normal(kw, (cout, cin, 4, 4), jnp.float32)
           ).astype(jnp.bfloat16).astype(jnp.float32)
    b = 0.05 * jax.random.normal(kb, (cout,), jnp.float32)
    w_mat, bias = _fold_down_weight(w_q, b, jnp.ones((cout,), jnp.float32))
    y = conv_down(jnp.transpose(x_bf, (1, 0, 2, 3)), w_mat, bias, "lrelu")
    y = jnp.transpose(y, (1, 0, 2, 3)).astype(jnp.float32)
    xpad = jnp.pad(x_q, ((0, 0), (0, 0), (1, 1), (1, 1)), mode="reflect")
    ref = jax.lax.conv_general_dilated(
        xpad, w_q, (2, 2), "VALID",
        dimension_numbers=("NCHW", "OIHW", "NCHW"),
        precision=jax.lax.Precision.HIGHEST)
    ref = _apply_act(ref + b[None, :, None, None], "lrelu")
    assert y.shape == ref.shape
    assert bool(jnp.allclose(y, ref, atol=3e-2, rtol=3e-2)), "conv_down mismatch"


def _check_conv_up(key):
    cin, cout, hh = 16, 8, 16
    kx, kw, kb = jax.random.split(key, 3)
    x_bf = jax.random.normal(kx, (1, cin, hh, hh), jnp.float32).astype(jnp.bfloat16)
    x_q = x_bf.astype(jnp.float32)
    w_q = (0.05 * jax.random.normal(kw, (cin, cout, 4, 4), jnp.float32)
           ).astype(jnp.bfloat16).astype(jnp.float32)
    b = 0.05 * jax.random.normal(kb, (cout,), jnp.float32)
    w_mats, bias = _fold_up_weight(w_q, b, jnp.ones((cout,), jnp.float32))
    y = conv_up(jnp.transpose(x_bf, (1, 0, 2, 3)), w_mats, bias, "relu")
    y = jnp.transpose(y, (1, 0, 2, 3)).astype(jnp.float32)
    w_oihw = jnp.transpose(w_q[:, :, ::-1, ::-1], (1, 0, 2, 3))
    ref = jax.lax.conv_general_dilated(
        x_q, w_oihw, window_strides=(1, 1), padding=((2, 2), (2, 2)),
        lhs_dilation=(2, 2), dimension_numbers=("NCHW", "OIHW", "NCHW"),
        precision=jax.lax.Precision.HIGHEST)
    ref = _apply_act(ref + b[None, :, None, None], "relu")
    assert y.shape == ref.shape
    assert bool(jnp.allclose(y, ref, atol=3e-2, rtol=3e-2)), "conv_up mismatch"


if __name__ == "__main__":
    key = jax.random.PRNGKey(0)
    pkey, xkey, t1, t2, t3 = jax.random.split(key, 5)

    # --- numerical self-checks: kernel + conv decompositions vs XLA refs ---
    _check_fused_matmul(t1)
    _check_conv_down(t2)
    _check_conv_up(t3)

    # --- full generator forward ---
    # spatial=256 is the smallest size the module supports (8 stride-2
    # halvings reach 1x1 at the bottleneck); batch/features kept small.
    in_channels, features = 3, 8
    params = make_params(pkey, in_channels=in_channels, features=features)
    x = jax.random.normal(xkey, (1, in_channels, 256, 256), jnp.float32)

    fwd = jax.jit(generator_forward)
    y = jax.block_until_ready(fwd(x, params))

    assert y.shape == (1, in_channels, 256, 256), y.shape
    assert bool(jnp.all(jnp.isfinite(y)))
    assert bool(jnp.all(jnp.abs(y) <= 1.0 + 1e-6))   # tanh output range
    print("KERNEL_OK")
</pallas_src>

<mosaic_0001>
module attributes {stable_mosaic.version = 11 : i64} {
  func.func @_fused_matmul_kernel(%arg0: i32, %arg1: i32, %arg2: memref<1x24x96xbf16, #tpu.memory_space<vmem>>, %arg3: memref<1x96x512xbf16, #tpu.memory_space<vmem>>, %arg4: memref<24x1xf32, #tpu.memory_space<vmem>>, %arg5: memref<1x24x512xbf16, #tpu.memory_space<vmem>>) attributes {dimension_semantics = [#tpu.dimension_semantics<parallel>, #tpu.dimension_semantics<parallel>], iteration_bounds = array<i64: 2, 1>, scalar_prefetch = 0 : i64, scratch_operands = 0 : i64, tpu.core_type = #tpu.core_type<tc>, window_params = [{transform_indices = @transform_0, window_bounds = array<i64: 1, 24, 96>}, {transform_indices = @transform_1, window_bounds = array<i64: 1, 96, 512>}, {pipeline_mode = #tpu.pipeline_mode<synchronous>, transform_indices = @transform_2, window_bounds = array<i64: 24, 1>}, {transform_indices = @transform_3, window_bounds = array<i64: 1, 24, 512>}]} {
    %c0 = arith.constant 0 : index
    %c0_0 = arith.constant 0 : index
    %c0_1 = arith.constant 0 : index
    %0 = vector.load %arg2[%c0, %c0_0, %c0_1] : memref<1x24x96xbf16, #tpu.memory_space<vmem>>, vector<1x24x96xbf16>
    %1 = vector.shape_cast %0 : vector<1x24x96xbf16> to vector<24x96xbf16>
    %c0_2 = arith.constant 0 : index
    %c0_3 = arith.constant 0 : index
    %c0_4 = arith.constant 0 : index
    %2 = vector.load %arg3[%c0_2, %c0_3, %c0_4] : memref<1x96x512xbf16, #tpu.memory_space<vmem>>, vector<1x96x512xbf16>
    %3 = vector.shape_cast %2 : vector<1x96x512xbf16> to vector<96x512xbf16>
    %cst = arith.constant dense<0.000000e+00> : vector<24x512xf32>
    %4 = tpu.matmul %1, %3, %cst {dimension_numbers = #tpu.dot_dimension_numbers<[1], [0], [0], [1], [0, 0, 1, 1], [], []>} : vector<24x96xbf16>, vector<96x512xbf16>, vector<24x512xf32> -> vector<24x512xf32>
    %c0_5 = arith.constant 0 : index
    %c0_6 = arith.constant 0 : index
    %5 = vector.load %arg4[%c0_5, %c0_6] : memref<24x1xf32, #tpu.memory_space<vmem>>, vector<24x1xf32>
    %6 = vector.broadcast %5 : vector<24x1xf32> to vector<24x512xf32>
    %7 = arith.addf %4, %6 : vector<24x512xf32>
    %cst_7 = arith.constant 0.000000e+00 : f32
    %8 = vector.broadcast %cst_7 : f32 to vector<24x512xf32>
    %9 = arith.cmpf ogt, %7, %8 : vector<24x512xf32>
    %cst_8 = arith.constant 2.000000e-01 : f32
    %10 = vector.broadcast %cst_8 : f32 to vector<24x512xf32>
    %11 = arith.mulf %10, %7 : vector<24x512xf32>
    %12 = arith.select %9, %7, %11 : vector<24x512xi1>, vector<24x512xf32>
    %13 = arith.truncf %12 : vector<24x512xf32> to vector<24x512xbf16>
    %c0_9 = arith.constant 0 : index
    %c0_10 = arith.constant 0 : index
    %c0_11 = arith.constant 0 : index
    %14 = vector.load %arg5[%c0_9, %c0_10, %c0_11] : memref<1x24x512xbf16, #tpu.memory_space<vmem>>, vector<1x24x512xbf16>
    %15 = vector.shape_cast %14 : vector<1x24x512xbf16> to vector<24x512xbf16>
    %16 = vector.shape_cast %13 : vector<24x512xbf16> to vector<1x24x512xbf16>
    tpu.vector_store %arg5[%c0_9, %c0_10, %c0_11], %16 {strides = array<i32>} : memref<1x24x512xbf16, #tpu.memory_space<vmem>>, vector<1x24x512xbf16>,
    return
  }
  func.func @transform_0(%arg0: i32, %arg1: i32) -> (i32, i32, i32) {
    %c0_i32 = arith.constant 0 : i32
    %c0_i32_0 = arith.constant 0 : i32
    %c0_i32_1 = arith.constant 0 : i32
    return %arg0, %c0_i32, %c0_i32_0 : i32, i32, i32
  }
  func.func @transform_1(%arg0: i32, %arg1: i32) -> (i32, i32, i32) {
    %c0_i32 = arith.constant 0 : i32
    %c0_i32_0 = arith.constant 0 : i32
    return %arg0, %c0_i32, %arg1 : i32, i32, i32
  }
  func.func @transform_2(%arg0: i32, %arg1: i32) -> (i32, i32) {
    %c0_i32 = arith.constant 0 : i32
    %c0_i32_0 = arith.constant 0 : i32
    %c0_i32_1 = arith.constant 0 : i32
    return %c0_i32, %c0_i32_0 : i32, i32
  }
  func.func @transform_3(%arg0: i32, %arg1: i32) -> (i32, i32, i32) {
    %c0_i32 = arith.constant 0 : i32
    %c0_i32_0 = arith.constant 0 : i32
    return %arg0, %c0_i32, %arg1 : i32, i32, i32
  }
}

</mosaic_0001>

<bundles_post_ra>
// kernel: tpu_custom_call.1
= control target key start
LH: loop header
LB: loop body
LE: loop exit
PB: predicated region body
PF: predicated region fallthrough
CT: control target
= control target key end

     0   :  { %8 = vsyncpa [#allocation3], 0  ;;  %s1248_s0 = inlined_call_operand.vmem [shape: bf16[2,24,96], index: 0, kind: input, shape index: {}]   ;;  %s1249_s1 = inlined_call_operand.hbm [shape: bf16[2,96,512], index: 1, kind: input, shape index: {}]   ;;  %s1250_s2 = inlined_call_operand.vmem [shape: f32[24,1], index: 2, kind: input, shape index: {}]   ;;  %s1251_s3 = inlined_call_operand.hbm [shape: bf16[2,24,512], index: 3, kind: output, shape index: {}]  }
   0x1   :  { %10 = vsyncpa [#allocation3 + $0x1], 0 }
   0x2   :  { %11 = vsyncpa [#allocation4], 0 }
   0x3   :  { %13 = vsyncpa [#allocation4 + $0x1], 0  ;;  %s1015_s12 = smov 0   ;;  %s1017_s13 = smov 0  }
   0x4   :  { %s1019_s14 = smov 0   ;;  %s1021_s15 = smov 0  }
   0x5   :  { %s1023_s16 = smov 0   ;;  %s1025_s17 = smov 0  }
   0x6 LB: > { %s709_s18 = sadd.s32 4294967295, %s986_s17   ;;  %s710_s19 = sadd.s32 4294967294, %s986_s17   ;;  %s986_s17 = sphi %s1025_s17, %s19_s17   ;;  %s982_s16 = sphi %s1023_s16, %s1266_s16   ;;  %s978_s15 = sphi %s1021_s15, %s1265_s15   ;;  %s974_s14 = sphi %s1019_s14, %s1264_s14   ;;  %s970_s13 = sphi %s1017_s13, %s1263_s13   ;;  %s966_s12 = sphi %s1015_s12, %s1262_s12  }
   0x7   : > { %s31_s20 = sadd.s32 1, %s982_s16  ;;  %s66_s21 = sadd.s32 1, %s974_s14 }
   0x8   : > { %p33_p0 = scmp.ge.s32.totalorder %s31_s20, 2  ;;  %p73_p1 = scmp.ne.s32.totalorder %s974_s14, %s970_s13 }
   0x9   : > { %p74_p2 = scmp.eq.s32.totalorder %s986_s17, 0  ;;  %p79_p3 = scmp.ne.s32.totalorder %s970_s13, %s966_s12 }
   0xa   : > { %s1268_s20 = smov (%p33_p0, %s31_s20), 0  ;;  %p80_p5 = scmp.eq.s32.totalorder %s709_s18, 0 }
   0xb   : > { %p1056_p4 = por %p74_p2, %p73_p1  ;;  %s61_s23 = ssub.s32 %s982_s16, %s1268_s20 }
   0xc   : > { %p126_p6 = scmp.eq.s32.totalorder %s709_s18, 1  ;;  %p64_p7 = scmp.eq.s32.totalorder %s61_s23, 0 }
   0xd   : > { %p1062_p8 = por %p80_p5, %p79_p3  ;;  %p132_p10 = scmp.eq.s32.totalorder %s710_s19, 1 }
   0xe   : > { %p1066_p9 = por %p126_p6, %p73_p1  ;;  %p779_p13 = scmp.lt.s32.totalorder %s986_s17, 2 }
   0xf   : > { %s1071_s26 = scalar_select %p64_p7, %s974_s14, %s66_s21  }
  0x10   : > { %s1255_s25 = scalar_select %p1066_p9, 1, 0 }
  0x11   : > { %p1073_p11 = por %p132_p10, %p79_p3  ;;  %s163_s28 = sand.u32 1, %s974_s14  }
  0x12   : > { %s761_s29 = smul.u32 192, %s163_s28  ;;  %p1083_p0 = pnand %p779_p13, %p1056_p4 }
  0x13   : > { %s1256_s27 = scalar_select %p1073_p11, 1, 0 }
  0x14   : > { %s762_s30 = smul.u32 3072, %s982_s16  ;;  %s167_s8 = scalar_lea.vmem [#allocation2], %s761_s29 }
  0x15   : > { %s176_s9 = sshll.u32 %s167_s8, 4  ;;  %s1095_s10 = scalar_lea.sflag [#allocation3], %s163_s28  ;;  %s1092_s9 = int_to_ptr.vmem [resolvable:$true] %s176_s9 }
  0x16   : > { %s1090_s7 = scalar_lea.hbm %s1249_s1, %s762_s30  ;;  %p876_p3 = pneg %p1083_p0 }
  0x17   : > { %s874_s11 = scalar_lea.hbm %s1090_s7, 3072  ;;  %s879_s21 = scalar_lea.hbm %s1249_s1, 6144 }
  0x18   : > { %p875_p2 = scmp.ne.s32.totalorder %s1090_s7, %s874_s11  ;;  %p880_p6 = scmp.lt.u32.totalorder %s1090_s7, %s1249_s1 }
  0x19   : > { %p881_p7 = scmp.lt.u32.totalorder %s879_s21, %s874_s11  ;;  %p883_p13 = scmp.lt.u32.totalorder %s874_s11, %s1090_s7 }
  0x1a   : > { %p877_p4 = pnand %p876_p3, %p875_p2 }
  0x1b   : > { %p882_p10 = por %p881_p7, %p880_p6 }
  0x1c   : > { %p878_p5 = pneg %p877_p4 }
  0x1d   : > { %p884_p12 = por %p883_p13, %p882_p10 }
  0x1f   : > { %p885_p1 = pnand %p884_p12, %p878_p5 }
  0x21   : > { %888 = shalt.err (!%p885_p1)
}
  0x22   : > { %s889_s28 = scalar_lea.vmem %s1092_s9, 3072  ;;  %s988_s29 = smov [#allocation2]  }
  0x23   : > { %p890_p2 = scmp.ne.s32.totalorder %s1092_s9, %s889_s28  ;;  %s894_s30 = sshll.u32 %s988_s29, 4  ;;  %s895_s30 = int_to_ptr.vmem [resolvable:$false] %s894_s30 }
  0x24   : > { %s896_s5 = scalar_lea.vmem %s895_s30, 6144  ;;  %p897_p9 = scmp.lt.s32.totalorder %s1092_s9, %s895_s30 }
  0x25   : > { %p892_p4 = pnand %p890_p2, %p876_p3  ;;  %p898_p6 = scmp.lt.s32.totalorder %s896_s5, %s889_s28 }
  0x27   : > { %p893_p11 = pneg %p892_p4  ;;  %p899_p7 = por %p898_p6, %p897_p9 }
  0x29   : > { %p900_p10 = pnand %p899_p7, %p893_p11 }
  0x2b   : > { %903 = shalt.err (!%p900_p10)
}
  0x2c   : > { %s989_s6 = smov 256   ;;  %s990_s8 = smov 16  }
  0x2d   : > { %774 = dma.hbm_to_vmem [thread:$0]  (!%p1083_p0), %s1090_s7, 3072, %s1092_s9, %s1095_s10, %s989_s6, %s989_s6, %s990_s8  }
  0x2e   : > { %p184_p12 = scmp.lt.s32.totalorder %s986_s17, 3  ;;  %p1258_p1 = scmp.ge.s32.totalorder %s986_s17, 1 }
  0x30   : > { %p185_p3 = pnand %p1258_p1, %p184_p12 }
  0x31   : > { %s1127_s11 = sand.u32 (!%p185_p3), 1, %s970_s13  }
  0x32   : > { %188 = sbr.rel (%p185_p3) target bundleno = 330 (0x14a), region = 32  ;;  %s191_s19 = scalar_lea.sflag (!%p185_p3), [#allocation3], %s1127_s11 }
  0x33   : > { %s763_s18 = smul.u32 (!%p185_p3), 192, %s1127_s11 }
  0x35   : > { %s1131_s21 = scalar_lea.vmem (!%p185_p3), [#allocation2], %s763_s18 }
  0x39   : > { %957 = dma.done.wait (%p1062_p8), %s191_s19, 3072  }
  0x3a   : > { %959 = vsyncadd (%p1062_p8), %s191_s19, 4294964224  ;;  %v991_v0 = vmov 0   ;;  %v836_v1 = vld [vmem:[%s1131_s21 + $0x4] ss:$16 sps:$4 sm:$0xff]   ;;  %v838_v2 = vld [vmem:[%s1131_s21 + $0xc] ss:$16 sps:$4 sm:$0xff]  }
  0x3b   : > { %442 = vmatprep.mubr.bf16.mxu0 %v991_v0  ;;  %493 = vmatprep.mubr.bf16.mxu1 %v991_v0  ;;  %v840_v3 = vld [vmem:[%s1131_s21] ss:$16 sps:$4 sm:$0xff]   ;;  %v841_v4 = vld [vmem:[%s1131_s21 + $0x8] ss:$16 sps:$4 sm:$0xff]   ;;  %p222_p8 = scmp.lt.s32.totalorder %s978_s15, 1  ;;  %vm403_vm0 = vcmask 785408  }
  0x3c   : > { %834 = vset.pattern.permute.xlu0 %v991_v0  ;;  %835 = vset.pattern.permute.xlu1 %v991_v0  ;;  %v842_v5 = vld [vmem:[%s1131_s21 + $0x24] ss:$16 sps:$4 sm:$0xff]   ;;  %v844_v6 = vld [vmem:[%s1131_s21 + $0x2c] ss:$16 sps:$4 sm:$0xff]   ;;  %v846_v7 = vld [vmem:[%s1131_s21 + $0x20] ss:$16 sps:$4 sm:$0xff]  }
  0x3d   : > { %410 = vmatprep.subr.bf16.mxu0 %v836_v1  ;;  %461 = vmatprep.subr.bf16.mxu1 %v838_v2  ;;  %v847_v8 = vld [vmem:[%s1131_s21 + $0x28] ss:$16 sps:$4 sm:$0xff]   ;;  %v848_v9 = vld [vmem:[%s1131_s21 + $0x44] ss:$16 sps:$4 sm:$0xff]   ;;  %s223_s24 = scalar_select %p222_p8, %s978_s15, 1 }
  0x3e   : > { %411 = vmatpush1.bf16.msra.mxu0 %v840_v3  ;;  %462 = vmatpush1.bf16.msra.mxu1 %v841_v4  ;;  %v850_v10 = vld [vmem:[%s1131_s21 + $0x4c] ss:$16 sps:$4 sm:$0xff]   ;;  %v852_v11 = vld [vmem:[%s1131_s21 + $0x40] ss:$16 sps:$4 sm:$0xff]   ;;  %v853_v12 = vld [vmem:[%s1131_s21 + $0x48] ss:$16 sps:$4 sm:$0xff]  }
  0x3f   : > { %412 = vmatprep.subr.bf16.mxu0 %v842_v5  ;;  %463 = vmatprep.subr.bf16.mxu1 %v844_v6  ;;  %v854_v13 = vld [vmem:[%s1131_s21 + $0x64] ss:$16 sps:$4 sm:$0xff]   ;;  %v856_v14 = vld [vmem:[%s1131_s21 + $0x6c] ss:$16 sps:$4 sm:$0xff]   ;;  %v858_v15 = vld [vmem:[%s1131_s21 + $0x60] ss:$16 sps:$4 sm:$0xff]  }
  0x40   : > { %s765_s4 = smul.u32 12, %s223_s24  ;;  %v859_v16 = vld [vmem:[%s1131_s21 + $0x68] ss:$16 sps:$4 sm:$0xff]   ;;  %v860_v17 = vld [vmem:[%s1131_s21 + $0x84] ss:$16 sps:$4 sm:$0xff]   ;;  %p1259_p11 = scmp.ne.s32.totalorder %s1255_s25, 0 }
  0x41   : > { %v862_v18 = vld [vmem:[%s1131_s21 + $0x8c] ss:$16 sps:$4 sm:$0xff]   ;;  %v864_v19 = vld [vmem:[%s1131_s21 + $0x80] ss:$16 sps:$4 sm:$0xff]   ;;  %v865_v20 = vld [vmem:[%s1131_s21 + $0x88] ss:$16 sps:$4 sm:$0xff]  }
  0x42   : > { %413 = vmatpush1.bf16.msra.mxu0 %v846_v7  ;;  %464 = vmatpush1.bf16.msra.mxu1 %v847_v8  ;;  %s226_s10 = scalar_lea.vmem %s1248_s0, %s765_s4  ;;  %v866_v21 = vld [vmem:[%s1131_s21 + $0xa4] ss:$16 sps:$4 sm:$0xff]   ;;  %v868_v22 = vld [vmem:[%s1131_s21 + $0xac] ss:$16 sps:$4 sm:$0xff]   ;;  %v870_v26 = vld [vmem:[%s1131_s21 + $0xa0] ss:$16 sps:$4 sm:$0xff]  }
  0x43   : > { %414 = vmatprep.subr.bf16.mxu0 %v848_v9  ;;  %465 = vmatprep.subr.bf16.mxu1 %v850_v10  ;;  %v257_v23 = vld [vmem:[%s1250_s2] sm:$0xff]  ;;  %v259_v24 = vld [vmem:[%s1250_s2 + $0x10] sm:$0xff]  ;;  %v258_v25 = vld [vmem:[%s1250_s2 + $0x8] sm:$0xff]  ;;  %s764_s6 = smul.u32 48, %s1127_s11  ;;  %s595_s4 = scalar_lea.sflag [#allocation4], %s1127_s11 }
  0x44   : > { %262 = vperm.xlu0 %834, %v257_v23   ;;  %272 = vperm.xlu1 %835, %v259_v24   ;;  %v871_v27 = vld [vmem:[%s1131_s21 + $0xa8] ss:$16 sps:$4 sm:$0xff]   ;;  %v872_v28 = vld [vmem:[%s226_s10] sm:$0xff]   ;;  %s766_s19 = smul.u32 768, %s978_s15  ;;  %s992_s9 = smov [#allocation5]  }
  0x45   : > { %v873_v29 = vld [vmem:[%s226_s10 + $0x8] ss:$0 sps:$4 sm:$0xff]   ;;  %s1184_s8 = scalar_lea.vmem [#allocation5], %s764_s6  ;;  %s908_s10 = sshll.u32 %s992_s9, 4  ;;  %s909_s10 = int_to_ptr.vmem [resolvable:$false] %s908_s10 }
  0x46   : > { %415 = vmatpush1.bf16.msra.mxu0 %v852_v11  ;;  %466 = vmatpush1.bf16.msra.mxu1 %v853_v12  ;;  %s610_s18 = sshll.u32 %s1184_s8, 4  ;;  %s1197_s24 = scalar_lea.hbm %s1251_s3, %s766_s19  ;;  %s1192_s18 = int_to_ptr.vmem [resolvable:$true] %s610_s18 }
  0x47   : > { %416 = vmatprep.subr.bf16.mxu0 %v854_v13  ;;  %467 = vmatprep.subr.bf16.mxu1 %v856_v14  ;;  %s904_s7 = scalar_lea.vmem %s1192_s18, 768  ;;  %s910_s22 = scalar_lea.vmem %s909_s10, 1536 }
  0x48   : > { %267 = vperm.xlu0 %834, %v258_v25   ;;  %p905_p9 = scmp.ne.s32.totalorder %s1192_s18, %s904_s7  ;;  %p911_p13 = scmp.lt.s32.totalorder %s1192_s18, %s909_s10 }
  0x49   : > { %p912_p2 = scmp.lt.s32.totalorder %s910_s22, %s904_s7 }
  0x4a   : > { %417 = vmatpush1.bf16.msra.mxu0 %v858_v15  ;;  %468 = vmatpush1.bf16.msra.mxu1 %v859_v16  ;;  %p906_p0 = pnand %p905_p9, %p1259_p11 }
  0x4b   : > { %418 = vmatprep.subr.bf16.mxu0 %v860_v17  ;;  %469 = vmatprep.subr.bf16.mxu1 %v862_v18  ;;  %p913_p4 = por %p912_p2, %p911_p13 }
  0x4c   : > { %p907_p5 = pneg %p906_p0 }
  0x4e   : > { %419 = vmatpush1.bf16.msra.mxu0 %v864_v19  ;;  %470 = vmatpush1.bf16.msra.mxu1 %v865_v20  ;;  %p914_p6 = pnand %p913_p4, %p907_p5 }
  0x4f   : > { %420 = vmatprep.subr.bf16.mxu0 %v866_v21  ;;  %471 = vmatprep.subr.bf16.mxu1 %v868_v22 }
  0x52   : > { %421 = vmatpush1.bf16.msra.mxu0 %v870_v26  ;;  %472 = vmatpush1.bf16.msra.mxu1 %v871_v27 }
  0x55   : > { %742 = vmatmul.mubr.msk.bf16.vlgmr.msra.gmra.mrb[0].mxu0 %vm403_vm0, %v872_v28  ;;  %744 = vmatmul.mubr.msk.bf16.vlgmr.msra.gmra.mrb[0].mxu1 %vm403_vm0, %v872_v28 }
  0x56   : > { %452 = vmatprep.mubr.bf16.mxu0 %v991_v0  ;;  %503 = vmatprep.mubr.bf16.mxu1 %v991_v0 }
  0x5d   : > { %743 = vmatmul.mubr.msk.bf16.gmra.mrb[4].mxu0 %vm403_vm0, %v873_v29  ;;  %745 = vmatmul.mubr.msk.bf16.gmra.mrb[4].mxu1 %vm403_vm0, %v873_v29 }
  0xc3   : > { %v263_v30 = vpop.permute.xlu0 %262  ;;  %v273_v59 = vpop.permute.xlu1 %272 }
  0xc7   : > { %v268_v31 = vpop.permute.xlu0 %267 }
 0x128   : > { %v444_v32 = vpop.f32.mrb[0].mxu0  ;;  %v495_v33 = vpop.f32.mrb[0].mxu1 }
 0x129   : > { %v445_v34 = vadd.f32 %v444_v32, %v263_v30  ;;  %v496_v35 = vadd.f32 %v495_v33, %v263_v30  ;;  %v446_v36 = vpop.f32.mrb[1].mxu0  ;;  %v497_v37 = vpop.f32.mrb[1].mxu1 }
 0x12a   : > { %v447_v38 = vadd.f32 %v446_v36, %v263_v30  ;;  %v498_v39 = vadd.f32 %v497_v37, %v263_v30  ;;  %v448_v40 = vpop.f32.mrb[2].mxu0  ;;  %v499_v41 = vpop.f32.mrb[2].mxu1 }
 0x12b   : > { %vm512_vm1 = vcmp.gt.f32.partialorder %v445_v34, 0.0  ;;  %v524_v42 = vmul.f32 0.2, %v445_v34  ;;  %vm514_vm2 = vcmp.gt.f32.partialorder %v496_v35, 0.0  ;;  %v526_v43 = vmul.f32 0.2, %v496_v35 }
 0x12c   : > { %vm513_vm3 = vcmp.gt.f32.partialorder %v447_v38, 0.0  ;;  %v525_v44 = vmul.f32 0.2, %v447_v38  ;;  %vm515_vm4 = vcmp.gt.f32.partialorder %v498_v39, 0.0  ;;  %v527_v45 = vmul.f32 0.2, %v498_v39 }
 0x12d   : > { %v536_v46 = vsel %vm512_vm1, %v445_v34, %v524_v42  ;;  %v538_v47 = vsel %vm514_vm2, %v496_v35, %v526_v43  ;;  %v449_v48 = vadd.f32 %v448_v40, %v268_v31  ;;  %v500_v49 = vadd.f32 %v499_v41, %v268_v31  ;;  %v450_v50 = vpop.f32.mrb[3].mxu0  ;;  %v501_v51 = vpop.f32.mrb[3].mxu1 }
 0x12e   : > { %v537_v52 = vsel %vm513_vm3, %v447_v38, %v525_v44  ;;  %v539_v53 = vsel %vm515_vm4, %v498_v39, %v527_v45  ;;  %v451_v54 = vadd.f32 %v450_v50, %v268_v31  ;;  %v502_v55 = vadd.f32 %v501_v51, %v268_v31 }
 0x12f   : > { %v755_v56 = vpack.c.bf16 %v537_v52, %v536_v46  ;;  %v756_v57 = vpack.c.bf16 %v539_v53, %v538_v47  ;;  %vm516_vm5 = vcmp.gt.f32.partialorder %v449_v48, 0.0  ;;  %v528_v58 = vmul.f32 0.2, %v449_v48 }
 0x130   : > { %vm518_vm6 = vcmp.gt.f32.partialorder %v500_v49, 0.0  ;;  %v530_v60 = vmul.f32 0.2, %v500_v49  ;;  %vm517_vm7 = vcmp.gt.f32.partialorder %v451_v54, 0.0  ;;  %v529_v61 = vmul.f32 0.2, %v451_v54 }
 0x131   : > { %588 = vst [vmem:[%s1184_s8] sm:$0xff] %v755_v56  ;;  %589 = vst [vmem:[%s1184_s8 + $0x8] sm:$0xff] %v756_v57  ;;  %v540_v62 = vsel %vm516_vm5, %v449_v48, %v528_v58  ;;  %vm519_vm8 = vcmp.gt.f32.partialorder %v502_v55, 0.0  ;;  %v531_v63 = vmul.f32 0.2, %v502_v55  ;;  %v454_v0 = vpop.f32.mrb[4].mxu0  ;;  %v505_v1 = vpop.f32.mrb[4].mxu1 }
 0x132   : > { %v542_v2 = vsel %vm518_vm6, %v500_v49, %v530_v60  ;;  %v541_v3 = vsel %vm517_vm7, %v451_v54, %v529_v61  ;;  %v455_v4 = vadd.f32 %v454_v0, %v273_v59  ;;  %v506_v5 = vadd.f32 %v505_v1, %v273_v59  ;;  %v456_v6 = vpop.f32.mrb[5].mxu0  ;;  %v507_v7 = vpop.f32.mrb[5].mxu1 }
 0x133   : > { %v757_v8 = vpack.c.bf16 %v541_v3, %v540_v62  ;;  %v543_v9 = vsel %vm519_vm8, %v502_v55, %v531_v63  ;;  %v457_v10 = vadd.f32 %v456_v6, %v273_v59  ;;  %v508_v11 = vadd.f32 %v507_v7, %v273_v59  ;;  %v458_v12 = vpop.f32.mrb[6].mxu0  ;;  %v509_v13 = vpop.f32.mrb[6].mxu1 }
 0x134   : > { %v758_v14 = vpack.c.bf16 %v543_v9, %v542_v2  ;;  %vm520_vm9 = vcmp.gt.f32.partialorder %v455_v4, 0.0  ;;  %v532_v15 = vmul.f32 0.2, %v455_v4  ;;  %vm522_vm10 = vcmp.gt.f32.partialorder %v506_v5, 0.0  ;;  %v459_v16 = vpop.f32.mrb[7].mxu0  ;;  %v510_v17 = vpop.f32.mrb[7].mxu1 }
 0x135   : > { %590 = vst [vmem:[%s1184_s8 + $0x10] sm:$0xff] %v757_v8  ;;  %v534_v18 = vmul.f32 0.2, %v506_v5  ;;  %vm521_vm11 = vcmp.gt.f32.partialorder %v457_v10, 0.0  ;;  %v533_v19 = vmul.f32 0.2, %v457_v10 }
 0x136   : > { %vm523_vm12 = vcmp.gt.f32.partialorder %v508_v11, 0.0  ;;  %591 = vst [vmem:[%s1184_s8 + $0x18] sm:$0xff] %v758_v14  ;;  %v544_v20 = vsel %vm520_vm9, %v455_v4, %v532_v15  ;;  %v535_v21 = vmul.f32 0.2, %v508_v11 }
 0x137   : > { %v546_v22 = vsel %vm522_vm10, %v506_v5, %v534_v18  ;;  %v545_v23 = vsel %vm521_vm11, %v457_v10, %v533_v19 }
 0x138   : > { %v759_v24 = vpack.c.bf16 %v545_v23, %v544_v20  ;;  %v547_v25 = vsel %vm523_vm12, %v508_v11, %v535_v21 }
 0x139   : > { %v760_v26 = vpack.c.bf16 %v547_v25, %v546_v22 }
 0x13a   : > { %592 = vst [vmem:[%s1184_s8 + $0x20] sm:$0xff] %v759_v24 }
 0x13b   : > { %593 = vst [vmem:[%s1184_s8 + $0x28] sm:$0xff] %v760_v26 }
 0x13c   : > { %917 = shalt.err (!%p914_p6)
}
 0x13d   : > { %s918_s23 = scalar_lea.hbm %s1197_s24, 768  ;;  %s922_s30 = scalar_lea.hbm %s1251_s3, 1536 }
 0x13e   : > { %p919_p7 = scmp.ne.s32.totalorder %s1197_s24, %s918_s23  ;;  %p923_p1 = scmp.lt.u32.totalorder %s1197_s24, %s1251_s3 }
 0x13f   : > { %p924_p3 = scmp.lt.u32.totalorder %s922_s30, %s918_s23  ;;  %p926_p9 = scmp.lt.u32.totalorder %s918_s23, %s1197_s24 }
 0x140   : > { %p920_p10 = pnand %p919_p7, %p1259_p11 }
 0x141   : > { %p925_p8 = por %p924_p3, %p923_p1 }
 0x142   : > { %p921_p12 = pneg %p920_p10 }
 0x143   : > { %p927_p0 = por %p926_p9, %p925_p8 }
 0x145   : > { %p928_p5 = pnand %p927_p0, %p921_p12 }
 0x147   : > { %931 = shalt.err (!%p928_p5)
}
 0x148   : > { %s993_s8 = smov 256   ;;  %s994_s19 = smov 16  }
 0x149   : > { %769 = dma.vmem_to_hbm [thread:$0]  (%p1259_p11), %s1192_s18, 768, %s1197_s24, %s595_s4, %s993_s8, %s993_s8, %s994_s19  }
 0x14a PF: > { %s625_s15 = sand.u32 1, %s966_s12   ;;  %p1260_p13 = scmp.ne.s32.totalorder %s1256_s27, 0 }
 0x14b   : > { %p1261_p2 = scmp.ge.s32.totalorder %s986_s17, 2  ;;  %s626_s21 = scalar_lea.sflag [#allocation4], %s625_s15 }
 0x14d   : > { %p776_p4 = pnand %p1261_p2, %p1260_p13 }
 0x14f   : > { %961 = dma.done.wait (!%p776_p4), %s626_s21, 768  }
 0x150   : > { %963 = vsyncadd (!%p776_p4), %s626_s21, 4294966528  ;;  %s19_s17 = sadd.s32 1, %s986_s17   ;;  %s1262_s12 = smov %s970_s13 }
 0x151   : > { %p16_p6 = scmp.ge.s32.totalorder %s19_s17, 4   ;;  %s1263_s13 = smov %s974_s14 }
 0x152   : > { %s1264_s14 = smov %s1071_s26  ;;  %s1265_s15 = smov %s982_s16 }
 0x153   : > { %s1266_s16 = smov %s1268_s20  ;;  %18 = sbr.rel (!%p16_p6) target bundleno = 6 (0x6), region = 80 }
 0x15a   :  { %631 = vsyncpa [#allocation3], 1 }
 0x15b   :  { %633 = vsyncpa [#allocation3 + $0x1], 1 }
 0x15c   :  { %634 = vsyncpa [#allocation4], 1 }
 0x15d   :  { %636 = vsyncpa [#allocation4 + $0x1], 1 }

</bundles_post_ra>
